<compile_context>
chip_gen: v7x
topology: tpu7x:2x2x1
jax: 0.10.0
libtpu: 0.0.40
codegen_flags: <defaults>
</compile_context>

<pallas_src>
import jax
import jax.numpy as jnp
import numpy as np
from jax.experimental import pallas as pl
from jax.experimental.pallas import tpu as pltpu

# ---- synthetic cfg (small, deterministic) -----------------------------------
NDF = 16          # cfg.GAN.NDF
NUM_ELT = 8       # cfg.KEYPOINT.NUM_ELT
NT = 32           # cfg.TEXT.TXT_EMBEDDING_DIM
BATCH = 8
EPS = 1e-5

D_LOC = NUM_ELT * 3          # 24
D_TXT = NT                   # 32
D_H1 = NDF * 4               # 64 per branch  -> 128 fused
D_H2 = NDF * 2               # 32 per branch  -> 64 fused (= judge input)
D_J = NDF * 2                # 32
LANES = 128

# weight-slab row layout (all offsets are multiples of 8 sublanes)
W1_LO, W1_HI = 0, LANES                     # (128,128) block-diag(lw1, tw1), padded rows
W2_LO, W2_HI = W1_HI, W1_HI + 2 * D_H1      # (128,128) block-diag(lw2, tw2)
W3_LO, W3_HI = W2_HI, W2_HI + LANES         # (128,128) jw1 in [0:64, 0:32]
BN_LO = W3_HI                               # 8 rows: gammas/betas, final bias, jw2 column
W_ROWS = BN_LO + 8                          # 392


# ---- Pallas kernel ------------------------------------------------------------
def keydis_kernel(x_ref, w_ref, out_ref):
    bn = w_ref[BN_LO:BN_LO + 8, :]          # one aligned (8,128) load; slice as values

    def bn_lrelu(x, gamma, beta):
        # Folded training-mode BatchNorm1d (biased batch var) + LeakyReLU(0.2).
        mean = jnp.mean(x, axis=0, keepdims=True)
        var = jnp.maximum(jnp.mean(x * x, axis=0, keepdims=True) - mean * mean, 0.0)
        scale = gamma * jax.lax.rsqrt(var + EPS)
        shift = beta - mean * scale
        y = x * scale + shift
        return jnp.maximum(y, 0.2 * y)       # LeakyReLU(0.2)

    # fused encoder layer 1: single matmul on the packed [locs | txts | 0-pad] input;
    # lanes 0:64 of h are loc_enc[0], lanes 64:128 are t_enc[0].
    h = jnp.dot(x_ref[...], w_ref[W1_LO:W1_HI, :], preferred_element_type=jnp.float32)
    h = bn_lrelu(h, bn[0:1, :], bn[1:2, :])
    # fused encoder layer 2: block-diag(lw2, tw2); cols 0:64 are cat(loc_enc(l), t_enc(t)),
    # cols 64:128 are exactly zero and stay zero (gamma=1, beta=0 on padded lanes).
    h = jnp.dot(h, w_ref[W2_LO:W2_HI, :], preferred_element_type=jnp.float32)
    h = bn_lrelu(h, bn[2:3, :], bn[3:4, :])
    # judge layer 1
    h = jnp.dot(h, w_ref[W3_LO:W3_HI, :], preferred_element_type=jnp.float32)
    h = bn_lrelu(h, bn[4:5, :], bn[5:6, :])
    # judge layer 2 (out_features=1): VPU mul + XLU lane reduce instead of an MXU dot.
    # bn row 7 holds jw2[:,0] (lanes 0:32), bn row 6 holds the final bias in lane 0.
    logit = jnp.sum(h * bn[7:8, :] + bn[6:7, :], axis=1, keepdims=True)
    # lane-dense store: broadcast across all 128 lanes; wrapper slices [:, :1].
    out_ref[...] = jnp.broadcast_to(jax.nn.sigmoid(logit), out_ref.shape)


# ---- parameter construction (deterministic, PyTorch-style) --------------------
def make_params(key):
    def lin(key, fan_in, fan_out):
        kw, kb = jax.random.split(key)
        bound = 1.0 / np.sqrt(fan_in)
        w = jax.random.uniform(kw, (fan_in, fan_out), jnp.float32, -bound, bound)
        b = jax.random.uniform(kb, (1, fan_out), jnp.float32, -bound, bound)
        return w, b

    def bn(fan_out):
        return jnp.ones((1, fan_out), jnp.float32), jnp.zeros((1, fan_out), jnp.float32)

    keys = jax.random.split(key, 6)
    params = []
    # loc_enc
    w, b = lin(keys[0], NUM_ELT * 3, NDF * 4); g, bt = bn(NDF * 4); params += [w, b, g, bt]
    w, b = lin(keys[1], NDF * 4, NDF * 2);     g, bt = bn(NDF * 2); params += [w, b, g, bt]
    # t_enc
    w, b = lin(keys[2], NT, NDF * 4);          g, bt = bn(NDF * 4); params += [w, b, g, bt]
    w, b = lin(keys[3], NDF * 4, NDF * 2);     g, bt = bn(NDF * 2); params += [w, b, g, bt]
    # judge
    w, b = lin(keys[4], NDF * 4, NDF * 2);     g, bt = bn(NDF * 2); params += [w, b, g, bt]
    w, b = lin(keys[5], NDF * 2, 1);                                params += [w, b]
    return params


def pack_params(params):
    """Pack the 22 PyTorch-style params into ONE contiguous (392,128) f32 slab
    (done once, outside the kernel).  Pre-BN Linear biases are dropped (they
    cancel against the training-mode BN mean subtraction; output is equivalent)."""
    (lw1, _lb1, lg1, lbt1, lw2, _lb2, lg2, lbt2,
     tw1, _tb1, tg1, tbt1, tw2, _tb2, tg2, tbt2,
     jw1, _jb1, jg1, jbt1, jw2, jb2) = params

    # layer-1 weight padded to 128 rows; input rows 56:128 are zero in the packed input.
    w1 = jnp.zeros((LANES, LANES), jnp.float32)
    w1 = w1.at[0:D_LOC, 0:D_H1].set(lw1)
    w1 = w1.at[D_LOC:D_LOC + D_TXT, D_H1:2 * D_H1].set(tw1)

    w2 = jnp.zeros((2 * D_H1, LANES), jnp.float32)
    w2 = w2.at[0:D_H1, 0:D_H2].set(lw2)
    w2 = w2.at[D_H1:, D_H2:2 * D_H2].set(tw2)

    w3 = jnp.zeros((LANES, LANES), jnp.float32)
    w3 = w3.at[0:2 * D_H2, 0:D_J].set(jw1)

    def lane_row(vals, fill):
        v = jnp.concatenate([jnp.asarray(x, jnp.float32).reshape(-1) for x in vals])
        pad = LANES - v.shape[0]
        if pad:
            v = jnp.concatenate([v, jnp.full((pad,), fill, jnp.float32)])
        return v

    bn_slab = jnp.stack([
        lane_row([lg1, tg1], 1.0),           # row 0: gamma, fused encoder layer 1
        lane_row([lbt1, tbt1], 0.0),         # row 1: beta
        lane_row([lg2, tg2], 1.0),           # row 2: gamma, fused encoder layer 2
        lane_row([lbt2, tbt2], 0.0),         # row 3: beta
        lane_row([jg1], 1.0),                # row 4: gamma, judge BN
        lane_row([jbt1], 0.0),               # row 5: beta
        lane_row([jb2], 0.0),                # row 6: final Linear bias (lane 0)
        lane_row([jw2[:, 0]], 0.0),          # row 7: jw2 column 0 (lanes 0:32)
    ], axis=0)                               # (8, 128)

    w_slab = jnp.concatenate([w1, w2, w3, bn_slab], axis=0)   # (392, 128)
    assert w_slab.shape == (W_ROWS, LANES)
    return w_slab


# ---- wrapper ------------------------------------------------------------------
@jax.jit
def keydis_forward(locs, txts, w_slab):
    # glue: locs.view(-1, num_elt * 3); pack [locs | txts | 0] into one 128-lane slab.
    locs_flat = locs.reshape(-1, D_LOC).astype(jnp.float32)
    txts = txts.astype(jnp.float32)
    B = locs_flat.shape[0]
    x = jnp.zeros((B, LANES), jnp.float32)
    x = x.at[:, 0:D_LOC].set(locs_flat)
    x = x.at[:, D_LOC:D_LOC + D_TXT].set(txts)

    vmem = pl.BlockSpec(memory_space=pltpu.MemorySpace.VMEM)
    out = pl.pallas_call(
        keydis_kernel,
        out_shape=jax.ShapeDtypeStruct((B, LANES), jnp.float32),  # lane-dense output
        in_specs=[vmem, vmem],
        out_specs=vmem,
    )(x, w_slab)
    return out[:, 0:1]


# ---- pure-JAX reference (unfused, two-pass BN; mirrors the PyTorch module) ----
def keydis_reference(locs, txts, params):
    def lin(x, w, b):
        return x @ w + b

    def bnorm(x, g, bt):
        m = x.mean(0, keepdims=True)
        v = ((x - m) ** 2).mean(0, keepdims=True)
        return (x - m) / jnp.sqrt(v + EPS) * g + bt

    def lrelu(x):
        return jnp.where(x > 0, x, 0.2 * x)

    (lw1, lb1, lg1, lbt1, lw2, lb2, lg2, lbt2,
     tw1, tb1, tg1, tbt1, tw2, tb2, tg2, tbt2,
     jw1, jb1, jg1, jbt1, jw2, jb2) = params

    l = locs.reshape(-1, NUM_ELT * 3)
    l = lrelu(bnorm(lin(l, lw1, lb1), lg1, lbt1))
    l = lrelu(bnorm(lin(l, lw2, lb2), lg2, lbt2))
    t = lrelu(bnorm(lin(txts, tw1, tb1), tg1, tbt1))
    t = lrelu(bnorm(lin(t, tw2, tb2), tg2, tbt2))
    x = jnp.concatenate([l, t], axis=1)
    x = lrelu(bnorm(lin(x, jw1, jb1), jg1, jbt1))
    x = lin(x, jw2, jb2)
    return jax.nn.sigmoid(x)


if __name__ == "__main__":
    key = jax.random.PRNGKey(0)
    k_locs, k_txts, k_params = jax.random.split(key, 3)

    locs = jax.random.normal(k_locs, (BATCH, NUM_ELT, 3), jnp.float32)
    txts = jax.random.normal(k_txts, (BATCH, NT), jnp.float32)
    params = make_params(k_params)
    w_slab = pack_params(params)   # one-time host/XLA-side packing

    out = keydis_forward(locs, txts, w_slab)
    out = jax.block_until_ready(out)

    ref = keydis_reference(locs, txts, params)
    assert out.shape == (BATCH, 1), out.shape
    np.testing.assert_allclose(np.asarray(out), np.asarray(ref), rtol=1e-4, atol=1e-5)

    print("KERNEL_OK")
</pallas_src>

<mosaic_0001>
module attributes {stable_mosaic.version = 11 : i64} {
  func.func @keydis_kernel(%arg0: memref<8x128xf32, #tpu.memory_space<vmem>>, %arg1: memref<392x128xf32, #tpu.memory_space<vmem>>, %arg2: memref<8x128xf32, #tpu.memory_space<vmem>>) attributes {dimension_semantics = [], scalar_prefetch = 0 : i64, scratch_operands = 0 : i64, tpu.core_type = #tpu.core_type<tc>} {
    %c384 = arith.constant 384 : index
    %c0 = arith.constant 0 : index
    %0 = vector.load %arg1[%c384, %c0] : memref<392x128xf32, #tpu.memory_space<vmem>>, vector<8x128xf32>
    %c0_0 = arith.constant 0 : index
    %c0_1 = arith.constant 0 : index
    %1 = vector.load %arg0[%c0_0, %c0_1] : memref<8x128xf32, #tpu.memory_space<vmem>>, vector<8x128xf32>
    %c0_2 = arith.constant 0 : index
    %c0_3 = arith.constant 0 : index
    %2 = vector.load %arg1[%c0_2, %c0_3] : memref<392x128xf32, #tpu.memory_space<vmem>>, vector<128x128xf32>
    %cst = arith.constant dense<0.000000e+00> : vector<8x128xf32>
    %3 = tpu.matmul %1, %2, %cst {dimension_numbers = #tpu.dot_dimension_numbers<[1], [0], [0], [1], [0, 0, 1, 1], [], []>} : vector<8x128xf32>, vector<128x128xf32>, vector<8x128xf32> -> vector<8x128xf32>
    %4 = vector.extract_strided_slice %0 {offsets = [0, 0], sizes = [1, 128], strides = [1, 1]} : vector<8x128xf32> to vector<1x128xf32>
    %5 = vector.extract_strided_slice %0 {offsets = [1, 0], sizes = [1, 128], strides = [1, 1]} : vector<8x128xf32> to vector<1x128xf32>
    %cst_4 = arith.constant dense<0.000000e+00> : vector<128xf32>
    %6 = vector.multi_reduction <add>, %3, %cst_4 [0] : vector<8x128xf32> to vector<128xf32>
    %7 = vector.shape_cast %6 : vector<128xf32> to vector<1x128xf32>
    %cst_5 = arith.constant 8.000000e+00 : f32
    %8 = vector.broadcast %cst_5 : f32 to vector<1x128xf32>
    %9 = arith.divf %7, %8 : vector<1x128xf32>
    %10 = arith.mulf %3, %3 : vector<8x128xf32>
    %cst_6 = arith.constant dense<0.000000e+00> : vector<128xf32>
    %11 = vector.multi_reduction <add>, %10, %cst_6 [0] : vector<8x128xf32> to vector<128xf32>
    %12 = vector.shape_cast %11 : vector<128xf32> to vector<1x128xf32>
    %cst_7 = arith.constant 8.000000e+00 : f32
    %13 = vector.broadcast %cst_7 : f32 to vector<1x128xf32>
    %14 = arith.divf %12, %13 : vector<1x128xf32>
    %15 = arith.mulf %9, %9 : vector<1x128xf32>
    %16 = arith.subf %14, %15 : vector<1x128xf32>
    %cst_8 = arith.constant 0.000000e+00 : f32
    %17 = vector.broadcast %cst_8 : f32 to vector<1x128xf32>
    %18 = arith.maximumf %16, %17 : vector<1x128xf32>
    %cst_9 = arith.constant 9.99999974E-6 : f32
    %19 = vector.broadcast %cst_9 : f32 to vector<1x128xf32>
    %20 = arith.addf %18, %19 : vector<1x128xf32>
    %21 = math.rsqrt %20 : vector<1x128xf32>
    %22 = arith.mulf %4, %21 : vector<1x128xf32>
    %23 = arith.mulf %9, %22 : vector<1x128xf32>
    %24 = arith.subf %5, %23 : vector<1x128xf32>
    %25 = vector.broadcast %22 : vector<1x128xf32> to vector<8x128xf32>
    %26 = arith.mulf %3, %25 : vector<8x128xf32>
    %27 = vector.broadcast %24 : vector<1x128xf32> to vector<8x128xf32>
    %28 = arith.addf %26, %27 : vector<8x128xf32>
    %cst_10 = arith.constant 2.000000e-01 : f32
    %29 = vector.broadcast %cst_10 : f32 to vector<8x128xf32>
    %30 = arith.mulf %29, %28 : vector<8x128xf32>
    %31 = arith.maximumf %28, %30 : vector<8x128xf32>
    %c128 = arith.constant 128 : index
    %c0_11 = arith.constant 0 : index
    %32 = vector.load %arg1[%c128, %c0_11] : memref<392x128xf32, #tpu.memory_space<vmem>>, vector<128x128xf32>
    %cst_12 = arith.constant dense<0.000000e+00> : vector<8x128xf32>
    %33 = tpu.matmul %31, %32, %cst_12 {dimension_numbers = #tpu.dot_dimension_numbers<[1], [0], [0], [1], [0, 0, 1, 1], [], []>} : vector<8x128xf32>, vector<128x128xf32>, vector<8x128xf32> -> vector<8x128xf32>
    %34 = vector.extract_strided_slice %0 {offsets = [2, 0], sizes = [1, 128], strides = [1, 1]} : vector<8x128xf32> to vector<1x128xf32>
    %35 = vector.extract_strided_slice %0 {offsets = [3, 0], sizes = [1, 128], strides = [1, 1]} : vector<8x128xf32> to vector<1x128xf32>
    %cst_13 = arith.constant dense<0.000000e+00> : vector<128xf32>
    %36 = vector.multi_reduction <add>, %33, %cst_13 [0] : vector<8x128xf32> to vector<128xf32>
    %37 = vector.shape_cast %36 : vector<128xf32> to vector<1x128xf32>
    %cst_14 = arith.constant 8.000000e+00 : f32
    %38 = vector.broadcast %cst_14 : f32 to vector<1x128xf32>
    %39 = arith.divf %37, %38 : vector<1x128xf32>
    %40 = arith.mulf %33, %33 : vector<8x128xf32>
    %cst_15 = arith.constant dense<0.000000e+00> : vector<128xf32>
    %41 = vector.multi_reduction <add>, %40, %cst_15 [0] : vector<8x128xf32> to vector<128xf32>
    %42 = vector.shape_cast %41 : vector<128xf32> to vector<1x128xf32>
    %cst_16 = arith.constant 8.000000e+00 : f32
    %43 = vector.broadcast %cst_16 : f32 to vector<1x128xf32>
    %44 = arith.divf %42, %43 : vector<1x128xf32>
    %45 = arith.mulf %39, %39 : vector<1x128xf32>
    %46 = arith.subf %44, %45 : vector<1x128xf32>
    %cst_17 = arith.constant 0.000000e+00 : f32
    %47 = vector.broadcast %cst_17 : f32 to vector<1x128xf32>
    %48 = arith.maximumf %46, %47 : vector<1x128xf32>
    %cst_18 = arith.constant 9.99999974E-6 : f32
    %49 = vector.broadcast %cst_18 : f32 to vector<1x128xf32>
    %50 = arith.addf %48, %49 : vector<1x128xf32>
    %51 = math.rsqrt %50 : vector<1x128xf32>
    %52 = arith.mulf %34, %51 : vector<1x128xf32>
    %53 = arith.mulf %39, %52 : vector<1x128xf32>
    %54 = arith.subf %35, %53 : vector<1x128xf32>
    %55 = vector.broadcast %52 : vector<1x128xf32> to vector<8x128xf32>
    %56 = arith.mulf %33, %55 : vector<8x128xf32>
    %57 = vector.broadcast %54 : vector<1x128xf32> to vector<8x128xf32>
    %58 = arith.addf %56, %57 : vector<8x128xf32>
    %cst_19 = arith.constant 2.000000e-01 : f32
    %59 = vector.broadcast %cst_19 : f32 to vector<8x128xf32>
    %60 = arith.mulf %59, %58 : vector<8x128xf32>
    %61 = arith.maximumf %58, %60 : vector<8x128xf32>
    %c256 = arith.constant 256 : index
    %c0_20 = arith.constant 0 : index
    %62 = vector.load %arg1[%c256, %c0_20] : memref<392x128xf32, #tpu.memory_space<vmem>>, vector<128x128xf32>
    %cst_21 = arith.constant dense<0.000000e+00> : vector<8x128xf32>
    %63 = tpu.matmul %61, %62, %cst_21 {dimension_numbers = #tpu.dot_dimension_numbers<[1], [0], [0], [1], [0, 0, 1, 1], [], []>} : vector<8x128xf32>, vector<128x128xf32>, vector<8x128xf32> -> vector<8x128xf32>
    %64 = vector.extract_strided_slice %0 {offsets = [4, 0], sizes = [1, 128], strides = [1, 1]} : vector<8x128xf32> to vector<1x128xf32>
    %65 = vector.extract_strided_slice %0 {offsets = [5, 0], sizes = [1, 128], strides = [1, 1]} : vector<8x128xf32> to vector<1x128xf32>
    %cst_22 = arith.constant dense<0.000000e+00> : vector<128xf32>
    %66 = vector.multi_reduction <add>, %63, %cst_22 [0] : vector<8x128xf32> to vector<128xf32>
    %67 = vector.shape_cast %66 : vector<128xf32> to vector<1x128xf32>
    %cst_23 = arith.constant 8.000000e+00 : f32
    %68 = vector.broadcast %cst_23 : f32 to vector<1x128xf32>
    %69 = arith.divf %67, %68 : vector<1x128xf32>
    %70 = arith.mulf %63, %63 : vector<8x128xf32>
    %cst_24 = arith.constant dense<0.000000e+00> : vector<128xf32>
    %71 = vector.multi_reduction <add>, %70, %cst_24 [0] : vector<8x128xf32> to vector<128xf32>
    %72 = vector.shape_cast %71 : vector<128xf32> to vector<1x128xf32>
    %cst_25 = arith.constant 8.000000e+00 : f32
    %73 = vector.broadcast %cst_25 : f32 to vector<1x128xf32>
    %74 = arith.divf %72, %73 : vector<1x128xf32>
    %75 = arith.mulf %69, %69 : vector<1x128xf32>
    %76 = arith.subf %74, %75 : vector<1x128xf32>
    %cst_26 = arith.constant 0.000000e+00 : f32
    %77 = vector.broadcast %cst_26 : f32 to vector<1x128xf32>
    %78 = arith.maximumf %76, %77 : vector<1x128xf32>
    %cst_27 = arith.constant 9.99999974E-6 : f32
    %79 = vector.broadcast %cst_27 : f32 to vector<1x128xf32>
    %80 = arith.addf %78, %79 : vector<1x128xf32>
    %81 = math.rsqrt %80 : vector<1x128xf32>
    %82 = arith.mulf %64, %81 : vector<1x128xf32>
    %83 = arith.mulf %69, %82 : vector<1x128xf32>
    %84 = arith.subf %65, %83 : vector<1x128xf32>
    %85 = vector.broadcast %82 : vector<1x128xf32> to vector<8x128xf32>
    %86 = arith.mulf %63, %85 : vector<8x128xf32>
    %87 = vector.broadcast %84 : vector<1x128xf32> to vector<8x128xf32>
    %88 = arith.addf %86, %87 : vector<8x128xf32>
    %cst_28 = arith.constant 2.000000e-01 : f32
    %89 = vector.broadcast %cst_28 : f32 to vector<8x128xf32>
    %90 = arith.mulf %89, %88 : vector<8x128xf32>
    %91 = arith.maximumf %88, %90 : vector<8x128xf32>
    %92 = vector.extract_strided_slice %0 {offsets = [7, 0], sizes = [1, 128], strides = [1, 1]} : vector<8x128xf32> to vector<1x128xf32>
    %93 = vector.broadcast %92 : vector<1x128xf32> to vector<8x128xf32>
    %94 = arith.mulf %91, %93 : vector<8x128xf32>
    %95 = vector.extract_strided_slice %0 {offsets = [6, 0], sizes = [1, 128], strides = [1, 1]} : vector<8x128xf32> to vector<1x128xf32>
    %96 = vector.broadcast %95 : vector<1x128xf32> to vector<8x128xf32>
    %97 = arith.addf %94, %96 : vector<8x128xf32>
    %cst_29 = arith.constant dense<0.000000e+00> : vector<8xf32>
    %98 = vector.multi_reduction <add>, %97, %cst_29 [1] : vector<8x128xf32> to vector<8xf32>
    %99 = vector.shape_cast %98 : vector<8xf32> to vector<8x1xf32>
    %100 = arith.negf %99 : vector<8x1xf32>
    %101 = math.exp %100 : vector<8x1xf32>
    %cst_30 = arith.constant 1.000000e+00 : f32
    %102 = vector.broadcast %cst_30 : f32 to vector<8x1xf32>
    %103 = arith.addf %102, %101 : vector<8x1xf32>
    %104 = arith.divf %102, %103 : vector<8x1xf32>
    %105 = vector.shape_cast %104 : vector<8x1xf32> to vector<8x1xf32>
    %106 = vector.broadcast %105 : vector<8x1xf32> to vector<8x128xf32>
    %c0_31 = arith.constant 0 : index
    %c0_32 = arith.constant 0 : index
    %107 = vector.load %arg2[%c0_31, %c0_32] : memref<8x128xf32, #tpu.memory_space<vmem>>, vector<8x128xf32>
    tpu.vector_store %arg2[%c0_31, %c0_32], %106 {strides = array<i32>} : memref<8x128xf32, #tpu.memory_space<vmem>>, vector<8x128xf32>,
    return
  }
}

</mosaic_0001>

<bundles_post_ra>
// kernel: keydis_forward.1
= control target key start
LH: loop header
LB: loop body
LE: loop exit
PB: predicated region body
PF: predicated region fallthrough
CT: control target
= control target key end

     0   :  { %7 = vsyncpa [#allocation3], 0  ;;  %s693_s9 = smov [#allocation2]   ;;  %s779_s0 = inlined_call_operand.vmem [shape: f32[8,128], index: 0, kind: input, shape index: {}]   ;;  %s780_s1 = inlined_call_operand.hbm [shape: f32[392,128], index: 1, kind: input, shape index: {}]   ;;  %s781_s2 = inlined_call_operand.vmem [shape: f32[8,128], index: 2, kind: output, shape index: {}]  }
   0x1   :  { %s15_s10 = sshll.u32 %s693_s9, 4  ;;  %s669_s13 = scalar_lea.hbm %s780_s1, 6272  ;;  %s16_s10 = int_to_ptr.vmem [resolvable:$true] %s15_s10 }
   0x2   :  { %p670_p0 = scmp.ne.s32.totalorder %s780_s1, %s669_s13  ;;  %p673_p1 = scmp.lt.u32.totalorder %s669_s13, %s780_s1 }
   0x4   :  { %p675_p2 = pnand %p673_p1, %p670_p0 }
   0x6   :  { %678 = shalt.err (!%p675_p2)
}
   0x7   :  { %s679_s18 = scalar_lea.vmem %s16_s10, 6272  ;;  %p684_p4 = scmp.lt.s32.totalorder %s16_s10, %s16_s10 }
   0x8   :  { %p680_p3 = scmp.ne.s32.totalorder %s16_s10, %s679_s18  ;;  %p685_p5 = scmp.lt.s32.totalorder %s679_s18, %s679_s18 }
   0xa   :  { %p686_p6 = por %p685_p5, %p684_p4 }
   0xc   :  { %p687_p7 = pnand %p686_p6, %p680_p3 }
   0xe   :  { %690 = shalt.err (!%p687_p7)
}
   0xf   :  { %s694_s19 = smov 128   ;;  %s695_s20 = smov 8  }
  0x10   :  { %21 = dma.hbm_to_vmem [thread:$0]  %s780_s1, 6272, %s16_s10, [#allocation3], %s694_s19, %s694_s19, %s695_s20  }
  0x11   :  { %691 = dma.done.wait [#allocation3], 6272  }
  0x12   :  { %692 = vsyncadd [#allocation3], 4294961024  ;;  %v696_v0 = vmov 0.0|0.0   ;;  %vm697_vm0 = vmmov 0   ;;  %v698_v1 = vmov 0.0   ;;  %v27_v2 = vld [vmem:[#allocation2] sm:$0xff] }
  0x13   :  { %581 = vmatprep.subr.bf16.mxu0 %v696_v0  ;;  %508 = vmatprep.mubr.msk.f32.mxu0 %vm697_vm0, %v698_v1  ;;  %v28_v3 = vld [vmem:[#allocation2 + $0x8] sm:$0xff]  ;;  %v29_v4 = vld [vmem:[#allocation2 + $0x10] sm:$0xff]  ;;  %v30_v6 = vld [vmem:[#allocation2 + $0x18] sm:$0xff] }
  0x14   :  { %605 = vmatprep.subr.bf16.mxu1 %v696_v0  ;;  %543 = vmatprep.mubr.msk.f32.mxu1 %vm697_vm0, %v698_v1  ;;  %v582_v5 = vpack.c.bf16 %v28_v3, %v27_v2  ;;  %v585_v7 = vpack.c.bf16 %v30_v6, %v29_v4  ;;  %v31_v8 = vld [vmem:[#allocation2 + $0x20] sm:$0xff]  ;;  %v32_v9 = vld [vmem:[#allocation2 + $0x28] sm:$0xff]  ;;  %v33_v11 = vld [vmem:[#allocation2 + $0x30] sm:$0xff] }
  0x15   :  { %v588_v10 = vpack.c.bf16 %v32_v9, %v31_v8  ;;  %v34_v12 = vld [vmem:[#allocation2 + $0x38] sm:$0xff]  ;;  %v35_v14 = vld [vmem:[#allocation2 + $0x40] sm:$0xff]  ;;  %v36_v15 = vld [vmem:[#allocation2 + $0x48] sm:$0xff]  ;;  %v140_v9 = vlaneseq }
  0x16   :  { %583 = vmatpush3.bf16.msra.mxu0 %v582_v5  ;;  %v591_v13 = vpack.c.bf16 %v34_v12, %v33_v11  ;;  %v594_v16 = vpack.c.bf16 %v36_v15, %v35_v14  ;;  %v37_v17 = vld [vmem:[#allocation2 + $0x50] sm:$0xff]  ;;  %v38_v18 = vld [vmem:[#allocation2 + $0x58] sm:$0xff]  ;;  %v39_v20 = vld [vmem:[#allocation2 + $0x60] sm:$0xff] }
  0x17   :  { %584 = vmatprep.subr.bf16.mxu0 %v696_v0  ;;  %v597_v19 = vpack.c.bf16 %v38_v18, %v37_v17  ;;  %v40_v21 = vld [vmem:[#allocation2 + $0x68] sm:$0xff]  ;;  %v41_v23 = vld [vmem:[#allocation2 + $0x70] sm:$0xff]  ;;  %v42_v24 = vld [vmem:[#allocation2 + $0x78] sm:$0xff] }
  0x18   :  { %v600_v22 = vpack.c.bf16 %v40_v21, %v39_v20  ;;  %v603_v25 = vpack.c.bf16 %v42_v24, %v41_v23  ;;  %v26_v26 = vld [vmem:[%s779_s0] sm:$0xff]  ;;  %v153_v28 = vld [vmem:[#allocation2 + $0x88] sm:$0xff]  ;;  %v154_v30 = vld [vmem:[#allocation2 + $0x90] sm:$0xff] }
  0x19   :  { %v152_v27 = vld [vmem:[#allocation2 + $0x80] sm:$0xff]  ;;  %v155_v31 = vld [vmem:[#allocation2 + $0x98] sm:$0xff]  ;;  %v157_v34 = vld [vmem:[#allocation2 + $0xa8] sm:$0xff] }
  0x1a   :  { %586 = vmatpush3.bf16.msra.mxu0 %v585_v7  ;;  %v606_v29 = vpack.c.bf16 %v153_v28, %v152_v27  ;;  %v609_v32 = vpack.c.bf16 %v155_v31, %v154_v30  ;;  %v156_v33 = vld [vmem:[#allocation2 + $0xa0] sm:$0xff]  ;;  %v158_v36 = vld [vmem:[#allocation2 + $0xb0] sm:$0xff]  ;;  %v159_v37 = vld [vmem:[#allocation2 + $0xb8] sm:$0xff] }
  0x1b   :  { %587 = vmatprep.subr.bf16.mxu0 %v696_v0  ;;  %v612_v35 = vpack.c.bf16 %v157_v34, %v156_v33  ;;  %v615_v38 = vpack.c.bf16 %v159_v37, %v158_v36  ;;  %v160_v39 = vld [vmem:[#allocation2 + $0xc0] sm:$0xff]  ;;  %v161_v40 = vld [vmem:[#allocation2 + $0xc8] sm:$0xff]  ;;  %v162_v42 = vld [vmem:[#allocation2 + $0xd0] sm:$0xff] }
  0x1c   :  { %607 = vmatpush3.bf16.msra.mxu1 %v606_v29  ;;  %v618_v41 = vpack.c.bf16 %v161_v40, %v160_v39  ;;  %v163_v43 = vld [vmem:[#allocation2 + $0xd8] sm:$0xff]  ;;  %v164_v45 = vld [vmem:[#allocation2 + $0xe0] sm:$0xff]  ;;  %v165_v46 = vld [vmem:[#allocation2 + $0xe8] sm:$0xff] }
  0x1d   :  { %608 = vmatprep.subr.bf16.mxu1 %v696_v0  ;;  %v621_v44 = vpack.c.bf16 %v163_v43, %v162_v42  ;;  %v624_v47 = vpack.c.bf16 %v165_v46, %v164_v45  ;;  %v166_v48 = vld [vmem:[#allocation2 + $0xf0] sm:$0xff]  ;;  %v167_v49 = vld [vmem:[#allocation2 + $0xf8] sm:$0xff]  ;;  %v751_v11 = vld [vmem:[#allocation2 + $0x180] sm:$0xff] }
  0x1e   :  { %589 = vmatpush3.bf16.msra.mxu0 %v588_v10  ;;  %v627_v50 = vpack.c.bf16 %v167_v49, %v166_v48  ;;  %v749_v10 = vshrl.u32 %v140_v9, 7  ;;  %v278_v28 = vld [vmem:[#allocation2 + $0x110] sm:$0xff]  ;;  %v279_v29 = vld [vmem:[#allocation2 + $0x118] sm:$0xff]  ;;  %v280_v31 = vld [vmem:[#allocation2 + $0x120] sm:$0xff] }
  0x1f   :  { %590 = vmatprep.subr.bf16.mxu0 %v696_v0  ;;  %v633_v30 = vpack.c.bf16 %v279_v29, %v278_v28  ;;  %v282_v34 = vld [vmem:[#allocation2 + $0x130] sm:$0xff]  ;;  %v284_v37 = vld [vmem:[#allocation2 + $0x140] sm:$0xff] }
  0x20   :  { %610 = vmatpush3.bf16.msra.mxu1 %v609_v32  ;;  %v142_v14 = vsub.s32 0, %v749_v10  ;;  %v147_v18 = vsub.s32 1, %v749_v10  ;;  %v281_v32 = vld [vmem:[#allocation2 + $0x128] sm:$0xff]  ;;  %v286_v40 = vld [vmem:[#allocation2 + $0x150] sm:$0xff]  ;;  %v288_v43 = vld [vmem:[#allocation2 + $0x160] sm:$0xff] }
  0x21   :  { %611 = vmatprep.subr.bf16.mxu1 %v696_v0  ;;  %v636_v33 = vpack.c.bf16 %v281_v32, %v280_v31  ;;  %v290_v46 = vld [vmem:[#allocation2 + $0x170] sm:$0xff] }
  0x22   :  { %592 = vmatpush3.bf16.msra.mxu0 %v591_v13 }
  0x23   :  { %593 = vmatprep.subr.bf16.mxu0 %v696_v0 }
  0x24   :  { %613 = vmatpush3.bf16.msra.mxu1 %v612_v35  ;;  %v283_v35 = vld [vmem:[#allocation2 + $0x138] sm:$0xff] }
  0x25   :  { %614 = vmatprep.subr.bf16.mxu1 %v696_v0  ;;  %v639_v36 = vpack.c.bf16 %v283_v35, %v282_v34 }
  0x26   :  { %595 = vmatpush3.bf16.msra.mxu0 %v594_v16 }
  0x27   :  { %596 = vmatprep.subr.bf16.mxu0 %v696_v0 }
  0x28   :  { %616 = vmatpush3.bf16.msra.mxu1 %v615_v38  ;;  %v285_v38 = vld [vmem:[#allocation2 + $0x148] sm:$0xff] }
  0x29   :  { %617 = vmatprep.subr.bf16.mxu1 %v696_v0  ;;  %v642_v39 = vpack.c.bf16 %v285_v38, %v284_v37 }
  0x2a   :  { %598 = vmatpush3.bf16.msra.mxu0 %v597_v19 }
  0x2b   :  { %599 = vmatprep.subr.bf16.mxu0 %v696_v0 }
  0x2c   :  { %619 = vmatpush3.bf16.msra.mxu1 %v618_v41  ;;  %v287_v41 = vld [vmem:[#allocation2 + $0x158] sm:$0xff] }
  0x2d   :  { %620 = vmatprep.subr.bf16.mxu1 %v696_v0  ;;  %v645_v42 = vpack.c.bf16 %v287_v41, %v286_v40 }
  0x2e   :  { %601 = vmatpush3.bf16.msra.mxu0 %v600_v22 }
  0x2f   :  { %602 = vmatprep.subr.bf16.mxu0 %v696_v0 }
  0x30   :  { %622 = vmatpush3.bf16.msra.mxu1 %v621_v44  ;;  %v289_v44 = vld [vmem:[#allocation2 + $0x168] sm:$0xff] }
  0x31   :  { %623 = vmatprep.subr.bf16.mxu1 %v696_v0  ;;  %v648_v45 = vpack.c.bf16 %v289_v44, %v288_v43  ;;  %v390_v44 = vsub.s32 4, %v749_v10 }
  0x32   :  { %604 = vmatpush3.bf16.msra.mxu0 %v603_v25  ;;  %v276_v25 = vld [vmem:[#allocation2 + $0x100] sm:$0xff] }
  0x33   :  { %629 = vmatprep.subr.bf16.mxu0 %v696_v0 }
  0x34   :  { %625 = vmatpush3.bf16.msra.mxu1 %v624_v47  ;;  %v291_v47 = vld [vmem:[#allocation2 + $0x178] sm:$0xff] }
  0x35   :  { %509 = vmatmul.mubr.f32.vlgmr.msra.gmra.mrb[0].mxu0 %v26_v26  ;;  %626 = vmatprep.subr.bf16.mxu1 %v696_v0  ;;  %v277_v26 = vld [vmem:[#allocation2 + $0x108] sm:$0xff]  ;;  %v651_v48 = vpack.c.bf16 %v291_v47, %v290_v46 }
  0x36   :  { %578 = vmatprep.mubr.msk.f32.mxu0 %vm697_vm0, %v698_v1  ;;  %v630_v27 = vpack.c.bf16 %v277_v26, %v276_v25 }
  0x38   :  { %628 = vmatpush3.bf16.msra.mxu1 %v627_v50  ;;  %631 = vmatpush3.bf16.msra.mxu0 %v630_v27 }
  0x39   :  { %632 = vmatprep.subr.bf16.mxu0 %v696_v0 }
  0x3c   :  { %634 = vmatpush3.bf16.msra.mxu0 %v633_v30 }
  0x3d   :  { %635 = vmatprep.subr.bf16.mxu0 %v696_v0 }
  0x40   :  { %637 = vmatpush3.bf16.msra.mxu0 %v636_v33 }
  0x41   :  { %638 = vmatprep.subr.bf16.mxu0 %v696_v0 }
  0x44   :  { %640 = vmatpush3.bf16.msra.mxu0 %v639_v36 }
  0x45   :  { %641 = vmatprep.subr.bf16.mxu0 %v696_v0 }
  0x48   :  { %643 = vmatpush3.bf16.msra.mxu0 %v642_v39 }
  0x49   :  { %644 = vmatprep.subr.bf16.mxu0 %v696_v0 }
  0x4c   :  { %646 = vmatpush3.bf16.msra.mxu0 %v645_v42 }
  0x4d   :  { %647 = vmatprep.subr.bf16.mxu0 %v696_v0 }
  0x50   :  { %649 = vmatpush3.bf16.msra.mxu0 %v648_v45 }
  0x51   :  { %650 = vmatprep.subr.bf16.mxu0 %v696_v0 }
  0x54   :  { %652 = vmatpush3.bf16.msra.mxu0 %v651_v48  ;;  %v395_v48 = vsub.s32 5, %v749_v10 }
 0x108   :  { %v109_v51 = vpop.f32.mrb[0].mxu0 }
 0x109   :  { %v113_v52 = vrot.slane %v109_v51, 4  ;;  %v121_v53 = vmul.f32 %v109_v51, %v109_v51  ;;  %v510_v54 = vpop.f32.mrb[1].mxu0 }
 0x10b   :  { %v114_v55 = vadd.f32 %v113_v52, %v109_v51  ;;  %v122_v56 = vrot.slane %v121_v53, 4 }
 0x10d   :  { %v115_v57 = vrot.slane %v114_v55, 2  ;;  %v123_v58 = vadd.f32 %v122_v56, %v121_v53 }
 0x10f   :  { %v116_v59 = vadd.f32 %v115_v57, %v114_v55  ;;  %v124_v60 = vrot.slane %v123_v58, 2 }
 0x111   :  { %v117_v61 = vrot.slane %v116_v59, 1  ;;  %v125_v62 = vadd.f32 %v124_v60, %v123_v58 }
 0x113   :  { %v118_v63 = vadd.f32 %v117_v61, %v116_v59  ;;  %v126_v1 = vrot.slane %v125_v62, 1 }
 0x115   :  { %v120_v2 = vmul.f32 0.125, %v118_v63  ;;  %v127_v3 = vadd.f32 %v126_v1, %v125_v62 }
 0x117   :  { %v128_v4 = vmul.f32 0.125, %v127_v3  ;;  %v129_v5 = vmul.f32 %v120_v2, %v120_v2 }
 0x119   :  { %v130_v6 = vsub.f32 %v128_v4, %v129_v5 }
 0x11b   :  { %v131_v7 = vmax.f32 %v130_v6, 0.0 }
 0x11d   :  { %v132_v8 = vadd.f32 1e-05, %v131_v7 }
 0x11f   :  { %659 = vrsqrt.f32 %v132_v8  ;;  %v266_v8 = vsub.s32 2, %v749_v10 }
 0x129   :  { %v660_v12 = vpop.eup %659 }
 0x12a   :  { %v134_v13 = vmul.f32 %v660_v12, %v751_v11 }
 0x12c   :  { %v135_v15 = vmul.f32 %v134_v13, %v120_v2  ;;  %v143_v16 = vrot.slane %v134_v13, %v142_v14  ;;  %v271_v14 = vsub.s32 3, %v749_v10 }
 0x12e   :  { %v137_v17 = vrot.slane %v135_v15, 7  ;;  %v144_v20 = vmul.f32 %v143_v16, %v109_v51 }
 0x130   :  { %v139_v19 = vsub.f32 %v751_v11, %v137_v17 }
 0x132   :  { %v148_v21 = vrot.slane %v139_v19, %v147_v18 }
 0x134   :  { %v149_v22 = vadd.f32 %v148_v21, %v144_v20 }
 0x136   :  { %v150_v23 = vmul.f32 0.2, %v149_v22 }
 0x138   :  { %v151_v24 = vmax.f32 %v149_v22, %v150_v23 }
 0x13a   :  { %544 = vmatmul.mubr.f32.vlgmr.msra.gmra.mrb[0].mxu1 %v151_v24 }
 0x20d   :  { %v234_v49 = vpop.f32.mrb[0].mxu1 }
 0x20e   :  { %v238_v50 = vrot.slane %v234_v49, 4  ;;  %v245_v51 = vmul.f32 %v234_v49, %v234_v49  ;;  %v545_v52 = vpop.f32.mrb[1].mxu1 }
 0x20f   :  { %v402_v52 = vsub.s32 7, %v749_v10 }
 0x210   :  { %v239_v53 = vadd.f32 %v238_v50, %v234_v49  ;;  %v246_v54 = vrot.slane %v245_v51, 4 }
 0x212   :  { %v240_v55 = vrot.slane %v239_v53, 2  ;;  %v247_v56 = vadd.f32 %v246_v54, %v245_v51  ;;  %v407_v54 = vsub.s32 6, %v749_v10 }
 0x214   :  { %v241_v57 = vadd.f32 %v240_v55, %v239_v53  ;;  %v248_v58 = vrot.slane %v247_v56, 2 }
 0x216   :  { %v242_v59 = vrot.slane %v241_v57, 1  ;;  %v249_v60 = vadd.f32 %v248_v58, %v247_v56  ;;  %v403_v56 = vrot.slane %v751_v11, %v402_v52  ;;  %v408_v58 = vrot.slane %v751_v11, %v407_v54 }
 0x218   :  { %v243_v61 = vadd.f32 %v242_v59, %v241_v57  ;;  %v250_v62 = vrot.slane %v249_v60, 1 }
 0x21a   :  { %v244_v63 = vmul.f32 0.125, %v243_v61  ;;  %v251_v0 = vadd.f32 %v250_v62, %v249_v60 }
 0x21c   :  { %v252_v1 = vmul.f32 0.125, %v251_v0  ;;  %v253_v2 = vmul.f32 %v244_v63, %v244_v63 }
 0x21e   :  { %v254_v3 = vsub.f32 %v252_v1, %v253_v2 }
 0x220   :  { %v255_v4 = vmax.f32 %v254_v3, 0.0 }
 0x222   :  { %v256_v5 = vadd.f32 1e-05, %v255_v4 }
 0x224   :  { %661 = vrsqrt.f32 %v256_v5 }
 0x22e   :  { %v662_v6 = vpop.eup %661 }
 0x22f   :  { %v258_v7 = vmul.f32 %v662_v6, %v751_v11 }
 0x231   :  { %v259_v9 = vmul.f32 %v258_v7, %v244_v63  ;;  %v267_v13 = vrot.slane %v258_v7, %v266_v8 }
 0x233   :  { %v261_v12 = vrot.slane %v259_v9, 7  ;;  %v268_v16 = vmul.f32 %v267_v13, %v234_v49 }
 0x235   :  { %v263_v15 = vsub.f32 %v751_v11, %v261_v12 }
 0x237   :  { %v272_v17 = vrot.slane %v263_v15, %v271_v14 }
 0x239   :  { %v273_v18 = vadd.f32 %v272_v17, %v268_v16 }
 0x23b   :  { %v274_v19 = vmul.f32 0.2, %v273_v18 }
 0x23d   :  { %v275_v20 = vmax.f32 %v273_v18, %v274_v19 }
 0x23f   :  { %579 = vmatmul.mubr.f32.vlgmr.msra.gmra.mrb[2].mxu0 %v275_v20 }
 0x312   :  { %v358_v21 = vpop.f32.mrb[2].mxu0 }
 0x313   :  { %v362_v22 = vrot.slane %v358_v21, 4  ;;  %v369_v23 = vmul.f32 %v358_v21, %v358_v21  ;;  %v580_v24 = vpop.f32.mrb[3].mxu0 }
 0x315   :  { %v363_v25 = vadd.f32 %v362_v22, %v358_v21  ;;  %v370_v26 = vrot.slane %v369_v23, 4 }
 0x317   :  { %v364_v27 = vrot.slane %v363_v25, 2  ;;  %v371_v28 = vadd.f32 %v370_v26, %v369_v23 }
 0x319   :  { %v365_v29 = vadd.f32 %v364_v27, %v363_v25  ;;  %v372_v30 = vrot.slane %v371_v28, 2 }
 0x31b   :  { %v366_v31 = vrot.slane %v365_v29, 1  ;;  %v373_v32 = vadd.f32 %v372_v30, %v371_v28 }
 0x31d   :  { %v367_v33 = vadd.f32 %v366_v31, %v365_v29  ;;  %v374_v34 = vrot.slane %v373_v32, 1 }
 0x31f   :  { %v368_v35 = vmul.f32 0.125, %v367_v33  ;;  %v375_v36 = vadd.f32 %v374_v34, %v373_v32 }
 0x321   :  { %v376_v37 = vmul.f32 0.125, %v375_v36  ;;  %v377_v38 = vmul.f32 %v368_v35, %v368_v35 }
 0x323   :  { %v378_v39 = vsub.f32 %v376_v37, %v377_v38 }
 0x325   :  { %v379_v40 = vmax.f32 %v378_v39, 0.0 }
 0x327   :  { %v380_v41 = vadd.f32 1e-05, %v379_v40 }
 0x329   :  { %663 = vrsqrt.f32 %v380_v41 }
 0x333   :  { %v664_v42 = vpop.eup %663 }
 0x334   :  { %v382_v43 = vmul.f32 %v664_v42, %v751_v11 }
 0x336   :  { %v383_v45 = vmul.f32 %v382_v43, %v368_v35  ;;  %v391_v46 = vrot.slane %v382_v43, %v390_v44 }
 0x338   :  { %v385_v47 = vrot.slane %v383_v45, 7  ;;  %v392_v50 = vmul.f32 %v391_v46, %v358_v21 }
 0x33a   :  { %v387_v49 = vsub.f32 %v751_v11, %v385_v47 }
 0x33c   :  { %v396_v51 = vrot.slane %v387_v49, %v395_v48 }
 0x33e   :  { %v397_v53 = vadd.f32 %v396_v51, %v392_v50 }
 0x340   :  { %v398_v55 = vmul.f32 0.2, %v397_v53 }
 0x342   :  { %v399_v57 = vmax.f32 %v397_v53, %v398_v55 }
 0x344   :  { %v404_v59 = vmul.f32 %v403_v56, %v399_v57 }
 0x346   :  { %v409_v60 = vadd.f32 %v408_v58, %v404_v59 }
 0x348   :  { %410 = vadd.xlane.f32.xlu0 %v409_v60 }
 0x3d5   :  { %v411_v61 = vpop.xlane.xlu0 %410 }
 0x3d6   :  { %v424_v62 = vmul.f32 -1.442695, %v411_v61 }
 0x3d8   :  { %665 = vpow2.f32 %v424_v62 }
 0x3e2   :  { %v666_v63 = vpop.eup %665 }
 0x3e3   :  { %v415_v0 = vadd.f32 1.0, %v666_v63 }
 0x3e5   :  { %667 = vrcp.f32 %v415_v0 }
 0x3ef   :  { %v668_v1 = vpop.eup %667 }
 0x3f0   :  { %418 = vst [vmem:[%s781_s2] sm:$0xff] %v668_v1 }
 0x3f1   :  { %423 = vsyncpa [#allocation3], 1 }

</bundles_post_ra>
